<compile_context>
chip_gen: v7x
topology: tpu7x:2x2x1
jax: 0.10.0
libtpu: 0.0.40
codegen_flags: <defaults>
</compile_context>

<pallas_src>
import math

import jax
import jax.numpy as jnp
from jax.experimental import pallas as pl
from jax.experimental.pallas import tpu as pltpu


_SMALL_BYPASS_BYTES = 1 << 20           # below this, jnp.broadcast_to wins
_TILE_BUDGET_BYTES = 12 * 1024 * 1024   # per output tile (double-buffered)
_VMEM_LIMIT_BYTES = 48 * 1024 * 1024    # < v7x 64 MiB physical VMEM


def _broadcast_logits_kernel(logits_ref, out_ref):
    # logits_ref: (1, L)  — replicated, lane-dense parameter row, resident in
    #                       VMEM across all grid steps (constant block index).
    # out_ref:    (tb, L) — lane-dense output tile (L % 128 == 0 when folded)
    #                       -> unmasked wide vst writeback.
    out_ref[...] = jnp.broadcast_to(logits_ref[...], out_ref.shape)


def _pick_batch_tile(rows, max_tb, sublane):
    """Sublane-aligned batch tile; keeps >=2 grid steps when the whole problem
    would otherwise fit a single tile (so both v7x TensorCores get work)."""
    if rows <= max_tb:
        target = -(-rows // 2)          # cdiv(rows, 2)
    else:
        target = max_tb
    tb = (target // sublane) * sublane
    tb = max(tb, sublane)
    tb = min(tb, rows)                  # tb==rows satisfies the (8,128) rule
    return tb


def learned_adjacency_global_forward(inputs, global_inputs, rel_rec, rel_send,
                                     logits, *, force_pallas=False):
    """Pallas implementation of LearnedAdjacancy_global.forward.

    inputs/global_inputs/rel_rec/rel_send are accepted for signature parity but
    only the batch size of `inputs` is used (exactly as in the PyTorch module).

    logits: (1, E, T) parameter. Returns (B, E, T) = logits repeated over batch.
    """
    batch_size = inputs.shape[0]
    _, E, T = logits.shape
    ET = E * T
    itemsize = jnp.dtype(logits.dtype).itemsize

    # Small-problem bypass: kernel launch + pipeline prologue dominate tiny
    # outputs, and XLA can fuse the broadcast into the consumer for free.
    if not force_pallas and batch_size * ET * itemsize < _SMALL_BYPASS_BYTES:
        return jnp.broadcast_to(logits, (batch_size, E, T))

    # ---- Lane-dense folding: fold G batch rows into the lane axis so the
    # kernel output's last dim is a multiple of 128 (unmasked stores).
    if ET % 128 == 0:
        G = 1
    else:
        G = 128 // math.gcd(ET, 128)
        if G * ET * itemsize > _TILE_BUDGET_BYTES:
            G = 1                       # pathological huge row: unfolded layout
    L = G * ET                          # kernel lane extent
    rows = -(-batch_size // G)          # cdiv(batch, G)
    batch_padded = rows * G

    # Replicated parameter row, built once outside the kernel (tiny: L elems).
    logits_row = logits.reshape(1, ET)
    if G > 1:
        logits_row = jnp.tile(logits_row, (1, G))   # (1, L)

    # Sublane packing for the dtype: 8 (f32) / 16 (bf16) / 32 (int8/fp8).
    sublane = max(8, 32 // max(1, itemsize * 8) * 8) if itemsize < 4 else 8
    sublane = {4: 8, 2: 16, 1: 32}.get(itemsize, 8)

    max_tb = max(1, _TILE_BUDGET_BYTES // max(1, L * itemsize))
    tb = _pick_batch_tile(rows, max_tb, sublane)
    grid = (pl.cdiv(rows, tb),)

    cost = pl.CostEstimate(
        flops=0,
        transcendentals=0,
        bytes_accessed=(rows * L + L) * itemsize,
    )

    out_folded = pl.pallas_call(
        _broadcast_logits_kernel,
        out_shape=jax.ShapeDtypeStruct((rows, L), logits.dtype),
        grid_spec=pl.GridSpec(
            grid=grid,
            in_specs=[
                # Constant block index -> parameter row stays resident, no re-DMA.
                pl.BlockSpec((1, L), lambda i: (0, 0)),
            ],
            out_specs=pl.BlockSpec((tb, L), lambda i: (i, 0)),
        ),
        compiler_params=pltpu.CompilerParams(
            dimension_semantics=("parallel",),
            vmem_limit_bytes=_VMEM_LIMIT_BYTES,
        ),
        cost_estimate=cost,
    )(logits_row)

    # (rows, G*ET) -> (rows*G, E, T) is a row-major reshape; drop batch padding.
    out = out_folded.reshape(batch_padded, E, T)
    if batch_padded != batch_size:
        out = out[:batch_size]
    return out


def init_logits(n_nodes, n_edge_types, dtype=jnp.float32):
    # torch.log(torch.ones((1, E, T)) * 0.5) == log(0.5) everywhere — deterministic.
    E = n_nodes * (n_nodes - 1)
    return jnp.full((1, E, n_edge_types), jnp.log(0.5), dtype=dtype)


if __name__ == "__main__":
    key = jax.random.PRNGKey(0)
    k1, k2, k3, k4 = jax.random.split(key, 4)

    # Small shapes consistent with the module's usage in GraphTrafficLib:
    # inputs: (batch, n_nodes, timesteps, features)
    batch = 2
    n_nodes = 5
    n_edge_types = 2
    timesteps = 8
    feat = 4
    E = n_nodes * (n_nodes - 1)

    inputs = jax.random.normal(k1, (batch, n_nodes, timesteps, feat), dtype=jnp.float32)
    global_inputs = jax.random.normal(k2, (batch, timesteps, feat), dtype=jnp.float32)
    rel_rec = jax.random.normal(k3, (E, n_nodes), dtype=jnp.float32)
    rel_send = jax.random.normal(k4, (E, n_nodes), dtype=jnp.float32)

    logits = init_logits(n_nodes, n_edge_types)
    ref = jnp.broadcast_to(logits, (batch, E, n_edge_types))

    # 1) Default production path (small-problem bypass).
    out = jax.block_until_ready(
        learned_adjacency_global_forward(inputs, global_inputs, rel_rec, rel_send, logits))
    assert out.shape == (batch, E, n_edge_types), out.shape
    assert out.dtype == logits.dtype, out.dtype
    assert bool(jnp.allclose(out, ref)), "bypass path mismatch vs reference"

    # 2) Forced Pallas path at the same small shapes (exercises kernel, lane
    #    folding and batch padding/slicing).
    out_k = jax.block_until_ready(
        learned_adjacency_global_forward(inputs, global_inputs, rel_rec, rel_send,
                                         logits, force_pallas=True))
    assert out_k.shape == ref.shape and out_k.dtype == logits.dtype
    assert bool(jnp.allclose(out_k, ref)), "pallas path mismatch vs reference"

    # 3) Larger batch through the kernel (lane-folded, multi-step grid).
    batch_big = 256
    inputs_big = jax.random.normal(k1, (batch_big, n_nodes, timesteps, feat),
                                   dtype=jnp.float32)
    gi_big = jax.random.normal(k2, (batch_big, timesteps, feat), dtype=jnp.float32)
    out_big = jax.block_until_ready(
        learned_adjacency_global_forward(inputs_big, gi_big, rel_rec, rel_send,
                                         logits, force_pallas=True))
    ref_big = jnp.broadcast_to(logits, (batch_big, E, n_edge_types))
    assert out_big.shape == ref_big.shape
    assert bool(jnp.allclose(out_big, ref_big)), "large-batch pallas mismatch"

    print("KERNEL_OK")
</pallas_src>

<mosaic_0001>
module attributes {stable_mosaic.version = 11 : i64} {
  func.func @_broadcast_logits_kernel(%arg0: i32, %arg1: memref<1x640xf32, #tpu.memory_space<vmem>>, %arg2: memref<1x640xf32, #tpu.memory_space<vmem>>) attributes {dimension_semantics = [#tpu.dimension_semantics<parallel>], iteration_bounds = array<i64: 1>, scalar_prefetch = 0 : i64, scratch_operands = 0 : i64, tpu.core_type = #tpu.core_type<tc>, window_params = [{pipeline_mode = #tpu.pipeline_mode<synchronous>, transform_indices = @transform_0, window_bounds = array<i64: 1, 640>}, {transform_indices = @transform_1, window_bounds = array<i64: 1, 640>}]} {
    %c0 = arith.constant 0 : index
    %c0_0 = arith.constant 0 : index
    %0 = vector.load %arg1[%c0, %c0_0] : memref<1x640xf32, #tpu.memory_space<vmem>>, vector<1x640xf32>
    %c0_1 = arith.constant 0 : index
    %c0_2 = arith.constant 0 : index
    %1 = vector.load %arg2[%c0_1, %c0_2] : memref<1x640xf32, #tpu.memory_space<vmem>>, vector<1x640xf32>
    tpu.vector_store %arg2[%c0_1, %c0_2], %0 {strides = array<i32>} : memref<1x640xf32, #tpu.memory_space<vmem>>, vector<1x640xf32>,
    return
  }
  func.func @transform_0(%arg0: i32) -> (i32, i32) {
    %c0_i32 = arith.constant 0 : i32
    %c0_i32_0 = arith.constant 0 : i32
    %c0_i32_1 = arith.constant 0 : i32
    return %c0_i32, %c0_i32_0 : i32, i32
  }
  func.func @transform_1(%arg0: i32) -> (i32, i32) {
    %c0_i32 = arith.constant 0 : i32
    %c0_i32_0 = arith.constant 0 : i32
    return %arg0, %c0_i32 : i32, i32
  }
}

</mosaic_0001>

<bundles_post_ra>
// kernel: tpu_custom_call.1
= control target key start
LH: loop header
LB: loop body
LE: loop exit
PB: predicated region body
PF: predicated region fallthrough
CT: control target
= control target key end

     0   :  { %6 = vsyncpa [#allocation3], 0  ;;  %s128_s0 = inlined_call_operand.hbm [shape: f32[1,640], index: 0, kind: input, shape index: {}]   ;;  %s129_s1 = inlined_call_operand.hbm [shape: f32[1,640], index: 1, kind: output, shape index: {}]  }
   0x1   :  { %7 = vsyncpa [#allocation4], 0  ;;  %s92_s6 = smov [#allocation2]   ;;  %s44_s10 = scalar_lea.hbm %s128_s0, 80 }
   0x2   :  { %s14_s7 = sshll.u32 %s92_s6, 4  ;;  %p45_p0 = scmp.ne.s32.totalorder %s128_s0, %s44_s10  ;;  %s15_s7 = int_to_ptr.vmem [resolvable:$true] %s14_s7 }
   0x3   :  { %p48_p1 = scmp.lt.u32.totalorder %s44_s10, %s128_s0 }
   0x5   :  { %p50_p2 = pnand %p48_p1, %p45_p0 }
   0x7   :  { %53 = shalt.err (!%p50_p2)
}
   0x8   :  { %s54_s15 = scalar_lea.vmem %s15_s7, 80  ;;  %s58_s16 = scalar_lea.vmem %s15_s7, 96 }
   0x9   :  { %p55_p3 = scmp.ne.s32.totalorder %s15_s7, %s54_s15  ;;  %p59_p4 = scmp.lt.s32.totalorder %s15_s7, %s15_s7 }
   0xa   :  { %p60_p5 = scmp.lt.s32.totalorder %s58_s16, %s54_s15 }
   0xc   :  { %p61_p6 = por %p60_p5, %p59_p4 }
   0xe   :  { %p62_p7 = pnand %p61_p6, %p55_p3 }
  0x10   :  { %65 = shalt.err (!%p62_p7)
}
  0x11   :  { %17 = dma.hbm_to_vmem [thread:$0]  %s128_s0, 80, %s15_s7, [#allocation3]  }
  0x12   :  { %88 = dma.done.wait [#allocation3], 80  }
  0x13   :  { %89 = vsyncadd [#allocation3], 4294967216  ;;  %v22_v0 = vlaneseq  ;;  %s93_s19 = smov [#allocation5]   ;;  %v21_v1 = vld [vmem:[#allocation2] sm:$0x1f] }
  0x14   :  { %s33_s20 = sshll.u32 %s93_s19, 4  ;;  %s34_s20 = int_to_ptr.vmem [resolvable:$true] %s33_s20 }
  0x15   :  { %vm24_vm0 = vcmp.lt.s32.totalorder %v22_v0, 640  ;;  %s66_s21 = scalar_lea.vmem %s34_s20, 80  ;;  %s70_s22 = scalar_lea.vmem %s34_s20, 96 }
  0x16   :  { %26 = vst.msk [vmem:[#allocation5] sm:$0x1f] %vm24_vm0, %v21_v1  ;;  %p67_p8 = scmp.ne.s32.totalorder %s34_s20, %s66_s21  ;;  %p71_p9 = scmp.lt.s32.totalorder %s34_s20, %s34_s20 }
  0x17   :  { %p72_p10 = scmp.lt.s32.totalorder %s70_s22, %s66_s21 }
  0x19   :  { %p73_p11 = por %p72_p10, %p71_p9 }
  0x1b   :  { %p74_p12 = pnand %p73_p11, %p67_p8 }
  0x1d   :  { %77 = shalt.err (!%p74_p12)
}
  0x1e   :  { %s78_s0 = scalar_lea.hbm %s129_s1, 80 }
  0x1f   :  { %p79_p13 = scmp.ne.s32.totalorder %s129_s1, %s78_s0  ;;  %p82_p0 = scmp.lt.u32.totalorder %s78_s0, %s129_s1 }
  0x21   :  { %p84_p1 = pnand %p82_p0, %p79_p13 }
  0x23   :  { %87 = shalt.err (!%p84_p1)
}
  0x24   :  { %36 = dma.vmem_to_hbm [thread:$0]  %s34_s20, 80, %s129_s1, [#allocation4]  }
  0x25   :  { %90 = dma.done.wait [#allocation4], 80  }
  0x26   :  { %91 = vsyncadd [#allocation4], 4294967216 }
  0x27   :  { %40 = vsyncpa [#allocation3], 1 }
  0x28   :  { %41 = vsyncpa [#allocation4], 1 }

</bundles_post_ra>
